<compile_context>
chip_gen: v6e
topology: v6e:2x2x1
jax: 0.10.0
libtpu: 0.0.40
codegen_flags: <defaults>
</compile_context>

<pallas_src>
import jax
import jax.numpy as jnp
from jax.experimental import pallas as pl
from jax.experimental.pallas import tpu as pltpu


def _round_up(a, b):
    return ((a + b - 1) // b) * b


def tcn_kernel(x_ref, w_ref, b_ref, o_ref):
    # x_ref : (2, 3*C_in, TN)  im2col operands for this column tile
    #                          (parity 0 -> conv cols 2j, parity 1 -> 2j+1)
    # w_ref : (C_out, 3*C_in)  fused conv weight (taps concatenated along K)
    # b_ref : (C_out, 1)       bias
    # o_ref : (C_out, TN)      pooled output tile
    w = w_ref[...]
    even = jnp.dot(w, x_ref[0], preferred_element_type=jnp.float32)
    odd = jnp.dot(w, x_ref[1], preferred_element_type=jnp.float32)
    # MaxPool first, then bias + ReLU on the pooled (C_out, TN) tensor.
    y = jnp.maximum(even, odd) + b_ref[...]
    o_ref[...] = jnp.maximum(y, 0.0).astype(o_ref.dtype)


def tcn_encoder(x, weight, bias, *, col_tile=512):
    """x: (B, C_in, L) f32; weight: (C_out, C_in, 3); bias: (C_out,)."""
    B, C_in, L = x.shape
    C_out = weight.shape[0]
    Lh = L // 2                      # MaxPool1d(2,2) floors, like PyTorch
    K3 = 3 * C_in

    # ---- wrapper-side glue (plain JAX / XLA) ------------------------------
    xp = jnp.pad(x, ((0, 0), (0, 0), (1, 1)))            # Conv1d padding=1
    # im2col by parity: X[p, b, k*C_in + c, j] = xp[b, c, 2*j + p + k]
    parts = []
    for p in range(2):
        rows = [xp[:, :, p + k: p + k + 2 * Lh: 2] for k in range(3)]
        parts.append(jnp.concatenate(rows, axis=1))      # (B, 3*C_in, Lh)
    xim = jnp.stack(parts, axis=0)                        # (2, B, 3*C_in, Lh)
    # Fold batch into lanes: (2, 3*C_in, B*Lh).
    xim = jnp.transpose(xim, (0, 2, 1, 3)).reshape(2, K3, B * Lh)

    N = B * Lh
    TN = min(col_tile, _round_up(max(N, 1), 128))
    N_pad = _round_up(max(N, 1), TN)
    xim = jnp.pad(xim, ((0, 0), (0, 0), (0, N_pad - N)))

    # Fused weight: W_cat[:, k*C_in + c] = weight[:, c, k].
    w_cat = jnp.transpose(weight, (0, 2, 1)).reshape(C_out, K3)
    b2 = bias.reshape(C_out, 1)
    # NOTE: on v6e/v7x cast xim / w_cat to bf16 here for 2x MXU throughput
    # (f32 accumulation is preserved via preferred_element_type).

    out = pl.pallas_call(
        tcn_kernel,
        out_shape=jax.ShapeDtypeStruct((C_out, N_pad), x.dtype),
        grid_spec=pltpu.PrefetchScalarGridSpec(
            num_scalar_prefetch=0,
            grid=(N_pad // TN,),
            in_specs=[
                pl.BlockSpec((2, K3, TN), lambda j: (0, 0, j)),
                pl.BlockSpec((C_out, K3), lambda j: (0, 0)),
                pl.BlockSpec((C_out, 1), lambda j: (0, 0)),
            ],
            out_specs=pl.BlockSpec((C_out, TN), lambda j: (0, j)),
        ),
        compiler_params=pltpu.CompilerParams(
            dimension_semantics=("parallel",)),
    )(xim, w_cat, b2)

    # Unpack lanes back to (B, C_out, Lh).
    out = out[:, :N].reshape(C_out, B, Lh)
    return jnp.transpose(out, (1, 0, 2))


def reference_forward(x, weight, bias):
    # Pure-JAX reference mirroring the PyTorch module.
    y = jax.lax.conv_general_dilated(
        x, weight, window_strides=(1,), padding=((1, 1),),
        dimension_numbers=("NCH", "OIH", "NCH"))
    y = y + bias[None, :, None]
    y = jnp.maximum(y, 0.0)
    B, C, L = y.shape
    Lh = L // 2
    return jnp.max(y[:, :, :2 * Lh].reshape(B, C, Lh, 2), axis=-1)


if __name__ == "__main__":
    B, C_in, C_out, L = 2, 4, 8, 16

    key = jax.random.PRNGKey(0)
    kx, kw, kb = jax.random.split(key, 3)

    x = jax.random.normal(kx, (B, C_in, L), dtype=jnp.float32)
    # Deterministic init mimicking PyTorch Conv1d default (uniform +/- 1/sqrt(fan_in)).
    bound = 1.0 / (C_in * 3) ** 0.5
    weight = jax.random.uniform(kw, (C_out, C_in, 3), jnp.float32, -bound, bound)
    bias = jax.random.uniform(kb, (C_out,), jnp.float32, -bound, bound)

    out = tcn_encoder(x, weight, bias)
    out = jax.block_until_ready(out)

    ref = reference_forward(x, weight, bias)
    assert out.shape == (B, C_out, L // 2), out.shape
    assert jnp.allclose(out, ref, atol=1e-5, rtol=1e-5), "mismatch vs reference"

    print("KERNEL_OK")
</pallas_src>

<mosaic_0001>
module attributes {stable_mosaic.version = 11 : i64} {
  func.func @tcn_kernel(%arg0: i32, %arg1: memref<2x12x128xf32, #tpu.memory_space<vmem>>, %arg2: memref<8x12xf32, #tpu.memory_space<vmem>>, %arg3: memref<8x1xf32, #tpu.memory_space<vmem>>, %arg4: memref<8x128xf32, #tpu.memory_space<vmem>>) attributes {dimension_semantics = [#tpu.dimension_semantics<parallel>], iteration_bounds = array<i64: 1>, scalar_prefetch = 0 : i64, scratch_operands = 0 : i64, tpu.core_type = #tpu.core_type<tc>, window_params = [{transform_indices = @transform_0, window_bounds = array<i64: 2, 12, 128>}, {pipeline_mode = #tpu.pipeline_mode<synchronous>, transform_indices = @transform_1, window_bounds = array<i64: 8, 12>}, {pipeline_mode = #tpu.pipeline_mode<synchronous>, transform_indices = @transform_2, window_bounds = array<i64: 8, 1>}, {transform_indices = @transform_3, window_bounds = array<i64: 8, 128>}]} {
    %c0 = arith.constant 0 : index
    %c0_0 = arith.constant 0 : index
    %0 = vector.load %arg2[%c0, %c0_0] : memref<8x12xf32, #tpu.memory_space<vmem>>, vector<8x12xf32>
    %c0_1 = arith.constant 0 : index
    %c0_2 = arith.constant 0 : index
    %c0_3 = arith.constant 0 : index
    %1 = vector.load %arg1[%c0_1, %c0_2, %c0_3] : memref<2x12x128xf32, #tpu.memory_space<vmem>>, vector<1x12x128xf32>
    %2 = vector.shape_cast %1 : vector<1x12x128xf32> to vector<12x128xf32>
    %cst = arith.constant dense<0.000000e+00> : vector<8x128xf32>
    %3 = tpu.matmul %0, %2, %cst {dimension_numbers = #tpu.dot_dimension_numbers<[1], [0], [0], [1], [0, 0, 1, 1], [], []>} : vector<8x12xf32>, vector<12x128xf32>, vector<8x128xf32> -> vector<8x128xf32>
    %c1 = arith.constant 1 : index
    %c0_4 = arith.constant 0 : index
    %c0_5 = arith.constant 0 : index
    %4 = vector.load %arg1[%c1, %c0_4, %c0_5] : memref<2x12x128xf32, #tpu.memory_space<vmem>>, vector<1x12x128xf32>
    %5 = vector.shape_cast %4 : vector<1x12x128xf32> to vector<12x128xf32>
    %cst_6 = arith.constant dense<0.000000e+00> : vector<8x128xf32>
    %6 = tpu.matmul %0, %5, %cst_6 {dimension_numbers = #tpu.dot_dimension_numbers<[1], [0], [0], [1], [0, 0, 1, 1], [], []>} : vector<8x12xf32>, vector<12x128xf32>, vector<8x128xf32> -> vector<8x128xf32>
    %7 = arith.maximumf %3, %6 : vector<8x128xf32>
    %c0_7 = arith.constant 0 : index
    %c0_8 = arith.constant 0 : index
    %8 = vector.load %arg3[%c0_7, %c0_8] : memref<8x1xf32, #tpu.memory_space<vmem>>, vector<8x1xf32>
    %9 = vector.broadcast %8 : vector<8x1xf32> to vector<8x128xf32>
    %10 = arith.addf %7, %9 : vector<8x128xf32>
    %cst_9 = arith.constant 0.000000e+00 : f32
    %11 = vector.broadcast %cst_9 : f32 to vector<8x128xf32>
    %12 = arith.maximumf %10, %11 : vector<8x128xf32>
    %c0_10 = arith.constant 0 : index
    %c0_11 = arith.constant 0 : index
    %13 = vector.load %arg4[%c0_10, %c0_11] : memref<8x128xf32, #tpu.memory_space<vmem>>, vector<8x128xf32>
    tpu.vector_store %arg4[%c0_10, %c0_11], %12 {strides = array<i32>} : memref<8x128xf32, #tpu.memory_space<vmem>>, vector<8x128xf32>,
    return
  }
  func.func @transform_0(%arg0: i32) -> (i32, i32, i32) {
    %c0_i32 = arith.constant 0 : i32
    %c0_i32_0 = arith.constant 0 : i32
    %c0_i32_1 = arith.constant 0 : i32
    return %c0_i32, %c0_i32_0, %arg0 : i32, i32, i32
  }
  func.func @transform_1(%arg0: i32) -> (i32, i32) {
    %c0_i32 = arith.constant 0 : i32
    %c0_i32_0 = arith.constant 0 : i32
    %c0_i32_1 = arith.constant 0 : i32
    return %c0_i32, %c0_i32_0 : i32, i32
  }
  func.func @transform_2(%arg0: i32) -> (i32, i32) {
    %c0_i32 = arith.constant 0 : i32
    %c0_i32_0 = arith.constant 0 : i32
    %c0_i32_1 = arith.constant 0 : i32
    return %c0_i32, %c0_i32_0 : i32, i32
  }
  func.func @transform_3(%arg0: i32) -> (i32, i32) {
    %c0_i32 = arith.constant 0 : i32
    %c0_i32_0 = arith.constant 0 : i32
    return %c0_i32, %arg0 : i32, i32
  }
}

</mosaic_0001>

<bundles_post_ra>
// kernel: tpu_custom_call.1
= control target key start
LH: loop header
LB: loop body
LE: loop exit
PB: predicated region body
PF: predicated region fallthrough
CT: control target
= control target key end

     0   :  { %vm22_vm0 = vcmask 1043456   ;;  %v249_v2 = vmov 0.0   ;;  %s294_s0 = inlined_call_operand.vmem [shape: f32[2,12,128], index: 0, kind: input, shape index: {}]   ;;  %s295_s1 = inlined_call_operand.vmem [shape: f32[8,12], index: 1, kind: input, shape index: {}]   ;;  %s296_s2 = inlined_call_operand.vmem [shape: f32[8,1], index: 2, kind: input, shape index: {}]   ;;  %s297_s3 = inlined_call_operand.hbm [shape: f32[8,128], index: 3, kind: output, shape index: {}]  }
   0x1   :  { %v17_v0 = vld [vmem:[%s294_s0 + $0x8] sm:$0xf]  ;;  %v199_v1 = vld [vmem:[%s294_s0 + $0x18] sm:$0xf]  ;;  %208 = vmatprep.subr.mxu0 %v249_v2  ;;  %215 = vmatprep.subr.mxu1 %v249_v2  ;;  %v16_v3 = vld [vmem:[%s294_s0] sm:$0xff] }
   0x2   :  { %209 = vmatpush3.msk.msra.mxu0 %vm22_vm0, %v17_v0  ;;  %216 = vmatpush3.msk.msra.mxu1 %vm22_vm0, %v199_v1  ;;  %v198_v4 = vld [vmem:[%s294_s0 + $0x10] sm:$0xff] }
   0x3   :  { %8 = vsyncpa [#allocation3], 0  ;;  %210 = vmatprep.subr.mxu0 %v249_v2  ;;  %217 = vmatprep.subr.mxu1 %v249_v2  ;;  %v15_v5 = vld [vmem:[%s295_s1] sm:$0xff]  ;;  %vm18_vm1 = vcmask 97280   ;;  %vm250_vm2 = vmmov 0   ;;  %v251_v7 = vmov 0  }
   0x4   :  { %211 = vmatpush3.msra.mxu0 %v16_v3  ;;  %212 = vmatprep.mubr.msk.f32.mxu0 %vm250_vm2, %v249_v2  ;;  %v173_v6 = vld [vmem:[%s296_s2] sm:$0xff]  ;;  %s252_s0 = smov [#allocation2]  }
   0x5   :  { %218 = vmatpush3.msra.mxu1 %v198_v4  ;;  %219 = vmatprep.mubr.msk.f32.mxu1 %vm250_vm2, %v249_v2  ;;  %s188_s1 = sshll.u32 %s252_s0, 4  ;;  %s189_s1 = int_to_ptr.vmem [resolvable:$true] %s188_s1 }
   0x6   :  { %213 = vmatmul.mubr.msk.f32.vlgmr.msra.gmra.mxu0 %vm18_vm1, %v15_v5  ;;  %220 = vmatmul.mubr.msk.f32.vlgmr.msra.gmra.mxu1 %vm18_vm1, %v15_v5  ;;  %s227_s24 = scalar_lea.vmem %s189_s1, 128  ;;  %p232_p1 = scmp.lt.s32.totalorder %s189_s1, %s189_s1 }
   0x7   :  { %226 = vset.pattern.permute.xlu0 %v251_v7  ;;  %p228_p0 = scmp.ne.s32.totalorder %s189_s1, %s227_s24  ;;  %p233_p2 = scmp.lt.s32.totalorder %s227_s24, %s227_s24 }
   0x8   :  { %176 = vperm.xlu0 %226, %v173_v6  }
   0x9   :  { %p234_p3 = por %p233_p2, %p232_p1 }
   0xb   :  { %p235_p4 = pnand %p234_p3, %p228_p0 }
  0x83   :  { %v177_v8 = vpop.permute.xlu0 %176 }
  0xc6   :  { %v92_v9 = vpop.f32.mrf.mxu0  ;;  %v168_v10 = vpop.f32.mrf.mxu1 }
  0xc7   :  { %v172_v11 = vmax.f32 %v92_v9, %v168_v10 }
  0xc8   :  { %v214_v12 = vpop.f32.mrf.mxu0  ;;  %v221_v13 = vpop.f32.mrf.mxu1 }
  0xc9   :  { %v179_v14 = vadd.f32 %v177_v8, %v172_v11 }
  0xcb   :  { %v180_v15 = vmax.f32 %v179_v14, 0.0 }
  0xcd   :  { %181 = vst [vmem:[#allocation2] sm:$0xff] %v180_v15 }
  0xce   :  { %238 = shalt.err (!%p235_p4)
}
  0xcf   :  { %191 = dma.vmem_to_hbm [thread:$0]  %s189_s1, 128, %s297_s3, [#allocation3]  }
  0xd0   :  { %247 = dma.done.wait [#allocation3], 128  }
  0xd1   :  { %248 = vsyncadd [#allocation3], 4294967168 }
  0xd2   :  { %195 = vsyncpa [#allocation3], 1 }

</bundles_post_ra>
